<compile_context>
chip_gen: v7x
topology: tpu7x:2x2x1
jax: 0.10.0
libtpu: 0.0.40
codegen_flags: <defaults>
</compile_context>

<pallas_src>
import jax
import jax.numpy as jnp
from jax.experimental import pallas as pl
from jax.experimental.pallas import tpu as pltpu


def _sigmoid(z):
    return 1.0 / (1.0 + jnp.exp(-z))


# ----------------------------------------------------------------------------
# Kernel 1: channel attention + apply, and spatial-attention input (mean/max
#           over channels of the scaled tensor).
# ----------------------------------------------------------------------------
def _channel_attn_kernel(x_ref, w1_ref, w2_ref, xca_ref, sa_ref):
    """x_ref: (1, C, HW); w1: (hid, C); w2: (C, hid);
    xca_ref: (1, C, HW) = x * channel_attention; sa_ref: (1, 2, HW)."""
    x = x_ref[0]                                             # (C, HW)
    hw = x.shape[1]

    avg = jnp.sum(x, axis=1, keepdims=True) * (1.0 / hw)     # (C, 1) lane reduce
    mx = jnp.max(x, axis=1, keepdims=True)                   # (C, 1)

    def mlp(p):                                              # p: (C, 1)
        h = jnp.dot(w1_ref[...], p, preferred_element_type=jnp.float32)   # (hid, 1)
        h = jnp.maximum(h, 0.0)
        return jnp.dot(w2_ref[...], h, preferred_element_type=jnp.float32)  # (C, 1)

    ca = _sigmoid(mlp(avg) + mlp(mx))                        # (C, 1)

    x_scaled = x * ca                                        # broadcast over lanes
    xca_ref[0] = x_scaled

    ch_mean = jnp.mean(x_scaled, axis=0, keepdims=True)      # (1, HW) sublane reduce
    ch_max = jnp.max(x_scaled, axis=0, keepdims=True)        # (1, HW)
    sa_ref[0] = jnp.concatenate([ch_mean, ch_max], axis=0)   # (2, HW)


def channel_attention_apply(x_flat, w1, w2):
    """x_flat: (N, C, HW); w1: (hid, C); w2: (C, hid)."""
    N, C, HW = x_flat.shape
    hid = w1.shape[0]
    return pl.pallas_call(
        _channel_attn_kernel,
        out_shape=(jax.ShapeDtypeStruct((N, C, HW), jnp.float32),
                   jax.ShapeDtypeStruct((N, 2, HW), jnp.float32)),
        grid_spec=pltpu.PrefetchScalarGridSpec(
            num_scalar_prefetch=0,
            grid=(N,),
            in_specs=[
                pl.BlockSpec((1, C, HW), lambda n: (n, 0, 0)),
                pl.BlockSpec((hid, C), lambda n: (0, 0)),
                pl.BlockSpec((C, hid), lambda n: (0, 0)),
            ],
            out_specs=[
                pl.BlockSpec((1, C, HW), lambda n: (n, 0, 0)),
                pl.BlockSpec((1, 2, HW), lambda n: (n, 0, 0)),
            ],
        ),
        compiler_params=pltpu.CompilerParams(
            dimension_semantics=("parallel",)),
    )(x_flat, w1, w2)


# ----------------------------------------------------------------------------
# Kernel 2: spatial attention (7x7 conv as a single K=98 matmul) + apply.
# ----------------------------------------------------------------------------
def _spatial_attn_kernel(xca_ref, col_ref, w_ref, o_ref):
    """xca_ref: (1, C, HW); col_ref: (1, 98, HW); w_ref: (1, 98); o: (1, C, HW)."""
    conv = jnp.dot(w_ref[...], col_ref[0],
                   preferred_element_type=jnp.float32)       # (1, HW)
    sa = _sigmoid(conv)                                      # (1, HW)
    o_ref[0] = xca_ref[0] * sa                               # broadcast over channels


def spatial_attention_apply(x_ca, cols, w_sa_flat):
    N, C, HW = x_ca.shape
    K = cols.shape[1]
    return pl.pallas_call(
        _spatial_attn_kernel,
        out_shape=jax.ShapeDtypeStruct((N, C, HW), jnp.float32),
        grid_spec=pltpu.PrefetchScalarGridSpec(
            num_scalar_prefetch=0,
            grid=(N,),
            in_specs=[
                pl.BlockSpec((1, C, HW), lambda n: (n, 0, 0)),
                pl.BlockSpec((1, K, HW), lambda n: (n, 0, 0)),
                pl.BlockSpec((1, K), lambda n: (0, 0)),
            ],
            out_specs=pl.BlockSpec((1, C, HW), lambda n: (n, 0, 0)),
        ),
        compiler_params=pltpu.CompilerParams(
            dimension_semantics=("parallel",)),
    )(x_ca, cols, w_sa_flat)


# ----------------------------------------------------------------------------
# JAX glue
# ----------------------------------------------------------------------------
def _build_sa_im2col(sa_in_flat, H, W):
    """(N, 2, H*W) -> (N, 98, H*W) patch matrix for the 7x7 'same' conv.

    Row order: tap-major ((dy, dx) row-major), channel minor."""
    N = sa_in_flat.shape[0]
    sa = sa_in_flat.reshape(N, 2, H, W)
    xp = jnp.pad(sa, ((0, 0), (0, 0), (3, 3), (3, 3)))
    cols = []
    for dy in range(7):
        for dx in range(7):
            cols.append(xp[:, :, dy:dy + H, dx:dx + W].reshape(N, 2, H * W))
    return jnp.concatenate(cols, axis=1)


def _torch_sa_weight_to_flat(w_oihw):
    """(1, 2, 7, 7) -> (1, 98), tap-major ((dy, dx) row-major), channel minor."""
    return jnp.transpose(w_oihw, (2, 3, 1, 0)).reshape(1, -1)


@jax.jit
def cbam_forward(x_nchw, w1, w2, w_sa):
    """cbam_block.forward.  x: (N, C, H, W) NCHW (PyTorch layout).

    w1: fc1 weight (C//16, C)   [Conv2d(C, C//16, 1, bias=False) squeezed]
    w2: fc2 weight (C, C//16)   [Conv2d(C//16, C, 1, bias=False) squeezed]
    w_sa: SpatialAttention conv weight (1, 2, 7, 7), no bias."""
    N, C, H, W = x_nchw.shape
    x_flat = x_nchw.reshape(N, C, H * W)
    x_ca, sa_in = channel_attention_apply(x_flat, w1, w2)
    cols = _build_sa_im2col(sa_in, H, W)
    y = spatial_attention_apply(x_ca, cols, _torch_sa_weight_to_flat(w_sa))
    return y.reshape(N, C, H, W)


# ----------------------------------------------------------------------------
# Pure-JAX reference (mirrors the PyTorch module) for a correctness check.
# ----------------------------------------------------------------------------
def cbam_reference(x, w1, w2, w_sa):
    avg = jnp.mean(x, axis=(2, 3))
    mx = jnp.max(x, axis=(2, 3))

    def mlp(p):
        h = jnp.maximum(p @ w1.T, 0.0)
        return h @ w2.T

    ca = jax.nn.sigmoid(mlp(avg) + mlp(mx))[:, :, None, None]
    x1 = x * ca
    ch_mean = jnp.mean(x1, axis=1, keepdims=True)
    ch_max = jnp.max(x1, axis=1, keepdims=True)
    sa_in = jnp.concatenate([ch_mean, ch_max], axis=1)
    conv = jax.lax.conv_general_dilated(
        sa_in, w_sa, window_strides=(1, 1), padding=((3, 3), (3, 3)),
        dimension_numbers=("NCHW", "OIHW", "NCHW"))
    return x1 * jax.nn.sigmoid(conv)


# ----------------------------------------------------------------------------
# Main
# ----------------------------------------------------------------------------
if __name__ == "__main__":
    # NOTE: ChannelAttention hard-codes `in_planes // 16` for fc1 (ignores the
    # ratio arg), so the channel count must be >= 16 for the module to be valid.
    N, C, H, W = 2, 32, 16, 16
    hid = C // 16

    key = jax.random.PRNGKey(0)
    k_x, k_w1, k_w2, k_wsa = jax.random.split(key, 4)

    x = jax.random.normal(k_x, (N, C, H, W), jnp.float32)
    w1 = 0.3 * jax.random.normal(k_w1, (hid, C), jnp.float32)      # fc1 (C//16, C, 1, 1) squeezed
    w2 = 0.3 * jax.random.normal(k_w2, (C, hid), jnp.float32)      # fc2 (C, C//16, 1, 1) squeezed
    w_sa = 0.1 * jax.random.normal(k_wsa, (1, 2, 7, 7), jnp.float32)

    out = cbam_forward(x, w1, w2, w_sa)
    out = jax.block_until_ready(out)

    ref = cbam_reference(x, w1, w2, w_sa)
    ref = jax.block_until_ready(ref)

    assert out.shape == (N, C, H, W)
    assert bool(jnp.all(jnp.isfinite(out)))
    assert jnp.allclose(out, ref, rtol=5e-3, atol=5e-3), \
        float(jnp.max(jnp.abs(out - ref)))
    print("KERNEL_OK")
</pallas_src>

<mosaic_0001>
module attributes {stable_mosaic.version = 11 : i64} {
  func.func @_channel_attn_kernel(%arg0: i32, %arg1: memref<1x32x256xf32, #tpu.memory_space<vmem>>, %arg2: memref<2x32xf32, #tpu.memory_space<vmem>>, %arg3: memref<32x2xf32, #tpu.memory_space<vmem>>, %arg4: memref<1x32x256xf32, #tpu.memory_space<vmem>>, %arg5: memref<1x2x256xf32, #tpu.memory_space<vmem>>) attributes {dimension_semantics = [#tpu.dimension_semantics<parallel>], iteration_bounds = array<i64: 2>, scalar_prefetch = 0 : i64, scratch_operands = 0 : i64, tpu.core_type = #tpu.core_type<tc>, window_params = [{transform_indices = @transform_0, window_bounds = array<i64: 1, 32, 256>}, {pipeline_mode = #tpu.pipeline_mode<synchronous>, transform_indices = @transform_1, window_bounds = array<i64: 2, 32>}, {pipeline_mode = #tpu.pipeline_mode<synchronous>, transform_indices = @transform_2, window_bounds = array<i64: 32, 2>}, {transform_indices = @transform_3, window_bounds = array<i64: 1, 32, 256>}, {transform_indices = @transform_4, window_bounds = array<i64: 1, 2, 256>}]} {
    %c0 = arith.constant 0 : index
    %c0_0 = arith.constant 0 : index
    %c0_1 = arith.constant 0 : index
    %0 = vector.load %arg1[%c0, %c0_0, %c0_1] : memref<1x32x256xf32, #tpu.memory_space<vmem>>, vector<1x32x256xf32>
    %1 = vector.shape_cast %0 : vector<1x32x256xf32> to vector<32x256xf32>
    %cst = arith.constant dense<0.000000e+00> : vector<32xf32>
    %2 = vector.multi_reduction <add>, %1, %cst [1] : vector<32x256xf32> to vector<32xf32>
    %3 = vector.shape_cast %2 : vector<32xf32> to vector<32x1xf32>
    %cst_2 = arith.constant 3.906250e-03 : f32
    %4 = vector.broadcast %cst_2 : f32 to vector<32x1xf32>
    %5 = arith.mulf %3, %4 : vector<32x1xf32>
    %cst_3 = arith.constant dense<0xFF800000> : vector<32xf32>
    %6 = vector.multi_reduction <maximumf>, %1, %cst_3 [1] : vector<32x256xf32> to vector<32xf32>
    %7 = vector.shape_cast %6 : vector<32xf32> to vector<32x1xf32>
    %c0_4 = arith.constant 0 : index
    %c0_5 = arith.constant 0 : index
    %8 = vector.load %arg2[%c0_4, %c0_5] : memref<2x32xf32, #tpu.memory_space<vmem>>, vector<2x32xf32>
    %cst_6 = arith.constant dense<0.000000e+00> : vector<2x1xf32>
    %9 = tpu.matmul %8, %5, %cst_6 {dimension_numbers = #tpu.dot_dimension_numbers<[1], [0], [0], [1], [0, 0, 1, 1], [], []>} : vector<2x32xf32>, vector<32x1xf32>, vector<2x1xf32> -> vector<2x1xf32>
    %cst_7 = arith.constant 0.000000e+00 : f32
    %10 = vector.broadcast %cst_7 : f32 to vector<2x1xf32>
    %11 = arith.maximumf %9, %10 : vector<2x1xf32>
    %c0_8 = arith.constant 0 : index
    %c0_9 = arith.constant 0 : index
    %12 = vector.load %arg3[%c0_8, %c0_9] : memref<32x2xf32, #tpu.memory_space<vmem>>, vector<32x2xf32>
    %cst_10 = arith.constant dense<0.000000e+00> : vector<32x1xf32>
    %13 = tpu.matmul %12, %11, %cst_10 {dimension_numbers = #tpu.dot_dimension_numbers<[1], [0], [0], [1], [0, 0, 1, 1], [], []>} : vector<32x2xf32>, vector<2x1xf32>, vector<32x1xf32> -> vector<32x1xf32>
    %c0_11 = arith.constant 0 : index
    %c0_12 = arith.constant 0 : index
    %14 = vector.load %arg2[%c0_11, %c0_12] : memref<2x32xf32, #tpu.memory_space<vmem>>, vector<2x32xf32>
    %cst_13 = arith.constant dense<0.000000e+00> : vector<2x1xf32>
    %15 = tpu.matmul %14, %7, %cst_13 {dimension_numbers = #tpu.dot_dimension_numbers<[1], [0], [0], [1], [0, 0, 1, 1], [], []>} : vector<2x32xf32>, vector<32x1xf32>, vector<2x1xf32> -> vector<2x1xf32>
    %cst_14 = arith.constant 0.000000e+00 : f32
    %16 = vector.broadcast %cst_14 : f32 to vector<2x1xf32>
    %17 = arith.maximumf %15, %16 : vector<2x1xf32>
    %c0_15 = arith.constant 0 : index
    %c0_16 = arith.constant 0 : index
    %18 = vector.load %arg3[%c0_15, %c0_16] : memref<32x2xf32, #tpu.memory_space<vmem>>, vector<32x2xf32>
    %cst_17 = arith.constant dense<0.000000e+00> : vector<32x1xf32>
    %19 = tpu.matmul %18, %17, %cst_17 {dimension_numbers = #tpu.dot_dimension_numbers<[1], [0], [0], [1], [0, 0, 1, 1], [], []>} : vector<32x2xf32>, vector<2x1xf32>, vector<32x1xf32> -> vector<32x1xf32>
    %20 = arith.addf %13, %19 : vector<32x1xf32>
    %cst_18 = arith.constant 0.000000e+00 : f32
    %21 = vector.broadcast %cst_18 : f32 to vector<32x1xf32>
    %22 = arith.subf %21, %20 : vector<32x1xf32>
    %23 = math.exp %22 : vector<32x1xf32>
    %cst_19 = arith.constant 1.000000e+00 : f32
    %24 = vector.broadcast %cst_19 : f32 to vector<32x1xf32>
    %25 = arith.addf %24, %23 : vector<32x1xf32>
    %cst_20 = arith.constant 1.000000e+00 : f32
    %26 = vector.broadcast %cst_20 : f32 to vector<32x1xf32>
    %27 = arith.divf %26, %25 : vector<32x1xf32>
    %28 = vector.broadcast %27 : vector<32x1xf32> to vector<32x256xf32>
    %29 = arith.mulf %1, %28 : vector<32x256xf32>
    %c0_21 = arith.constant 0 : index
    %c0_22 = arith.constant 0 : index
    %c0_23 = arith.constant 0 : index
    %30 = vector.load %arg4[%c0_21, %c0_22, %c0_23] : memref<1x32x256xf32, #tpu.memory_space<vmem>>, vector<1x32x256xf32>
    %31 = vector.shape_cast %30 : vector<1x32x256xf32> to vector<32x256xf32>
    %32 = vector.shape_cast %29 : vector<32x256xf32> to vector<1x32x256xf32>
    tpu.vector_store %arg4[%c0_21, %c0_22, %c0_23], %32 {strides = array<i32>} : memref<1x32x256xf32, #tpu.memory_space<vmem>>, vector<1x32x256xf32>,
    %cst_24 = arith.constant dense<0.000000e+00> : vector<256xf32>
    %33 = vector.multi_reduction <add>, %29, %cst_24 [0] : vector<32x256xf32> to vector<256xf32>
    %34 = vector.shape_cast %33 : vector<256xf32> to vector<1x256xf32>
    %cst_25 = arith.constant 3.200000e+01 : f32
    %35 = vector.broadcast %cst_25 : f32 to vector<1x256xf32>
    %36 = arith.divf %34, %35 : vector<1x256xf32>
    %cst_26 = arith.constant dense<0xFF800000> : vector<256xf32>
    %37 = vector.multi_reduction <maximumf>, %29, %cst_26 [0] : vector<32x256xf32> to vector<256xf32>
    %38 = vector.shape_cast %37 : vector<256xf32> to vector<1x256xf32>
    %39 = tpu.concatenate %36, %38 in 0 : vector<1x256xf32>, vector<1x256xf32> -> vector<2x256xf32>
    %c0_27 = arith.constant 0 : index
    %c0_28 = arith.constant 0 : index
    %c0_29 = arith.constant 0 : index
    %40 = vector.load %arg5[%c0_27, %c0_28, %c0_29] : memref<1x2x256xf32, #tpu.memory_space<vmem>>, vector<1x2x256xf32>
    %41 = vector.shape_cast %40 : vector<1x2x256xf32> to vector<2x256xf32>
    %42 = vector.shape_cast %39 : vector<2x256xf32> to vector<1x2x256xf32>
    tpu.vector_store %arg5[%c0_27, %c0_28, %c0_29], %42 {strides = array<i32>} : memref<1x2x256xf32, #tpu.memory_space<vmem>>, vector<1x2x256xf32>,
    return
  }
  func.func @transform_0(%arg0: i32) -> (i32, i32, i32) {
    %c0_i32 = arith.constant 0 : i32
    %c0_i32_0 = arith.constant 0 : i32
    %c0_i32_1 = arith.constant 0 : i32
    return %arg0, %c0_i32, %c0_i32_0 : i32, i32, i32
  }
  func.func @transform_1(%arg0: i32) -> (i32, i32) {
    %c0_i32 = arith.constant 0 : i32
    %c0_i32_0 = arith.constant 0 : i32
    %c0_i32_1 = arith.constant 0 : i32
    return %c0_i32, %c0_i32_0 : i32, i32
  }
  func.func @transform_2(%arg0: i32) -> (i32, i32) {
    %c0_i32 = arith.constant 0 : i32
    %c0_i32_0 = arith.constant 0 : i32
    %c0_i32_1 = arith.constant 0 : i32
    return %c0_i32, %c0_i32_0 : i32, i32
  }
  func.func @transform_3(%arg0: i32) -> (i32, i32, i32) {
    %c0_i32 = arith.constant 0 : i32
    %c0_i32_0 = arith.constant 0 : i32
    %c0_i32_1 = arith.constant 0 : i32
    return %arg0, %c0_i32, %c0_i32_0 : i32, i32, i32
  }
  func.func @transform_4(%arg0: i32) -> (i32, i32, i32) {
    %c0_i32 = arith.constant 0 : i32
    %c0_i32_0 = arith.constant 0 : i32
    %c0_i32_1 = arith.constant 0 : i32
    return %arg0, %c0_i32, %c0_i32_0 : i32, i32, i32
  }
}

module attributes {stable_mosaic.version = 11 : i64} {
  func.func @_spatial_attn_kernel(%arg0: i32, %arg1: memref<1x32x256xf32, #tpu.memory_space<vmem>>, %arg2: memref<1x98x256xf32, #tpu.memory_space<vmem>>, %arg3: memref<1x98xf32, #tpu.memory_space<vmem>>, %arg4: memref<1x32x256xf32, #tpu.memory_space<vmem>>) attributes {dimension_semantics = [#tpu.dimension_semantics<parallel>], iteration_bounds = array<i64: 2>, scalar_prefetch = 0 : i64, scratch_operands = 0 : i64, tpu.core_type = #tpu.core_type<tc>, window_params = [{transform_indices = @transform_0, window_bounds = array<i64: 1, 32, 256>}, {transform_indices = @transform_1, window_bounds = array<i64: 1, 98, 256>}, {pipeline_mode = #tpu.pipeline_mode<synchronous>, transform_indices = @transform_2, window_bounds = array<i64: 1, 98>}, {transform_indices = @transform_3, window_bounds = array<i64: 1, 32, 256>}]} {
    %c0 = arith.constant 0 : index
    %c0_0 = arith.constant 0 : index
    %0 = vector.load %arg3[%c0, %c0_0] : memref<1x98xf32, #tpu.memory_space<vmem>>, vector<1x98xf32>
    %c0_1 = arith.constant 0 : index
    %c0_2 = arith.constant 0 : index
    %c0_3 = arith.constant 0 : index
    %1 = vector.load %arg2[%c0_1, %c0_2, %c0_3] : memref<1x98x256xf32, #tpu.memory_space<vmem>>, vector<1x98x256xf32>
    %2 = vector.shape_cast %1 : vector<1x98x256xf32> to vector<98x256xf32>
    %cst = arith.constant dense<0.000000e+00> : vector<1x256xf32>
    %3 = tpu.matmul %0, %2, %cst {dimension_numbers = #tpu.dot_dimension_numbers<[1], [0], [0], [1], [0, 0, 1, 1], [], []>} : vector<1x98xf32>, vector<98x256xf32>, vector<1x256xf32> -> vector<1x256xf32>
    %cst_4 = arith.constant 0.000000e+00 : f32
    %4 = vector.broadcast %cst_4 : f32 to vector<1x256xf32>
    %5 = arith.subf %4, %3 : vector<1x256xf32>
    %6 = math.exp %5 : vector<1x256xf32>
    %cst_5 = arith.constant 1.000000e+00 : f32
    %7 = vector.broadcast %cst_5 : f32 to vector<1x256xf32>
    %8 = arith.addf %7, %6 : vector<1x256xf32>
    %cst_6 = arith.constant 1.000000e+00 : f32
    %9 = vector.broadcast %cst_6 : f32 to vector<1x256xf32>
    %10 = arith.divf %9, %8 : vector<1x256xf32>
    %c0_7 = arith.constant 0 : index
    %c0_8 = arith.constant 0 : index
    %c0_9 = arith.constant 0 : index
    %11 = vector.load %arg1[%c0_7, %c0_8, %c0_9] : memref<1x32x256xf32, #tpu.memory_space<vmem>>, vector<1x32x256xf32>
    %12 = vector.shape_cast %11 : vector<1x32x256xf32> to vector<32x256xf32>
    %13 = vector.broadcast %10 : vector<1x256xf32> to vector<32x256xf32>
    %14 = arith.mulf %12, %13 : vector<32x256xf32>
    %c0_10 = arith.constant 0 : index
    %c0_11 = arith.constant 0 : index
    %c0_12 = arith.constant 0 : index
    %15 = vector.load %arg4[%c0_10, %c0_11, %c0_12] : memref<1x32x256xf32, #tpu.memory_space<vmem>>, vector<1x32x256xf32>
    %16 = vector.shape_cast %15 : vector<1x32x256xf32> to vector<32x256xf32>
    %17 = vector.shape_cast %14 : vector<32x256xf32> to vector<1x32x256xf32>
    tpu.vector_store %arg4[%c0_10, %c0_11, %c0_12], %17 {strides = array<i32>} : memref<1x32x256xf32, #tpu.memory_space<vmem>>, vector<1x32x256xf32>,
    return
  }
  func.func @transform_0(%arg0: i32) -> (i32, i32, i32) {
    %c0_i32 = arith.constant 0 : i32
    %c0_i32_0 = arith.constant 0 : i32
    %c0_i32_1 = arith.constant 0 : i32
    return %arg0, %c0_i32, %c0_i32_0 : i32, i32, i32
  }
  func.func @transform_1(%arg0: i32) -> (i32, i32, i32) {
    %c0_i32 = arith.constant 0 : i32
    %c0_i32_0 = arith.constant 0 : i32
    %c0_i32_1 = arith.constant 0 : i32
    return %arg0, %c0_i32, %c0_i32_0 : i32, i32, i32
  }
  func.func @transform_2(%arg0: i32) -> (i32, i32) {
    %c0_i32 = arith.constant 0 : i32
    %c0_i32_0 = arith.constant 0 : i32
    %c0_i32_1 = arith.constant 0 : i32
    return %c0_i32, %c0_i32_0 : i32, i32
  }
  func.func @transform_3(%arg0: i32) -> (i32, i32, i32) {
    %c0_i32 = arith.constant 0 : i32
    %c0_i32_0 = arith.constant 0 : i32
    %c0_i32_1 = arith.constant 0 : i32
    return %arg0, %c0_i32, %c0_i32_0 : i32, i32, i32
  }
}

</mosaic_0001>

<bundles_post_ra>
// kernel: cbam_forward.2
= control target key start
LH: loop header
LB: loop body
LE: loop exit
PB: predicated region body
PF: predicated region fallthrough
CT: control target
= control target key end

     0   :  { %s960_s15 = smov 0   ;;  %s1053_s0 = inlined_call_operand.vmem [shape: f32[2,32,256], index: 0, kind: input, shape index: {}]   ;;  %s1054_s1 = inlined_call_operand.vmem [shape: f32[2,32], index: 1, kind: input, shape index: {}]   ;;  %s1055_s2 = inlined_call_operand.vmem [shape: f32[32,2], index: 2, kind: input, shape index: {}]   ;;  %s1056_s3 = inlined_call_operand.vmem [shape: f32[2,32,256], index: 3, kind: output, shape index: {0}]   ;;  %s1057_s4 = inlined_call_operand.vmem [shape: f32[2,2,256], index: 4, kind: output, shape index: {1}]  }
   0x1 LB: > { %s790_s16 = sadd.s32 4294967295, %s929_s15   ;;  %p794_p0 = scmp.ge.s32.totalorder %s929_s15, 1  ;;  %s929_s15 = sphi %s960_s15, %s15_s15  }
   0x2   : > { %p165_p1 = scmp.lt.s32.totalorder %s929_s15, 3 }
   0x4   : > { %p166_p2 = pnand %p794_p0, %p165_p1 }
   0x5   : > { %p196_p3 = scmp.lt.s32.totalorder (!%p166_p2), %s790_s16, 1  ;;  %v931_v16 = vmov (!%p166_p2), 0.0|0.0   ;;  %vm932_vm0 = vmmov (!%p166_p2), 0   ;;  %v933_v17 = vmov (!%p166_p2), 0.0   ;;  %v247_v31 = vld [vmem:[%s1054_s1] sm:$0x3] (!%p166_p2) }
   0x6   : > { %169 = sbr.rel (%p166_p2) target bundleno = 809 (0x329), region = 32  ;;  %877 = vmatprep.subr.bf16.mxu1 (!%p166_p2), %v931_v16  ;;  %847 = vmatprep.mubr.msk.f32.mxu1 (!%p166_p2), %vm932_vm0, %v933_v17  ;;  %vm248_vm1 = vcmask (!%p166_p2), 261120   ;;  %v323_v35 = vld [vmem:[%s1055_s2] sm:$0xff] (!%p166_p2)  ;;  %vm398_vm2 = vcmask (!%p166_p2), 15360   ;;  %vm411_vm3 = vcmask (!%p166_p2), 1041408   ;;  %v324_v41 = vld [vmem:[%s1055_s2 + $0x8] sm:$0xff] (!%p166_p2) }
   0x7   : > { %863 = vmatprep.mubr.msk.f32.mxu0 (!%p166_p2), %vm398_vm2, %v323_v35  ;;  %v325_v43 = vld [vmem:[%s1055_s2 + $0x10] sm:$0xff] (!%p166_p2)  ;;  %v326_v44 = vld [vmem:[%s1055_s2 + $0x18] sm:$0xff] (!%p166_p2)  ;;  %v934_v45 = vmov (!%p166_p2), 0   ;;  %vm687_vm4 = vcmask (!%p166_p2), 1040384  }
   0x8   : > { %906 = vset.pattern.permute.xlu1 (!%p166_p2), %v934_v45  ;;  %905 = vset.pattern.permute.xlu0 (!%p166_p2), %v934_v45 }
   0xd   : > { %s1059_s16 = smov (!%p196_p3, %s790_s16), 1 }
   0xe   : > { %s816_s17 = sshll.u32 %s1059_s16, 6  ;;  %s818_s8 = sshll.u32 %s1059_s16, 2 }
   0xf   : > { %s200_s20 = scalar_lea.vmem %s1053_s0, %s816_s17  ;;  %s205_s7 = scalar_lea.vmem %s1056_s3, %s816_s17 }
  0x10   : > { %v976_v0 = vld [vmem:[%s200_s20 + $0x20] sm:$0xff]  ;;  %v978_v1 = vld [vmem:[%s200_s20 + $0x28] sm:$0xff]  ;;  %v986_v5 = vld [vmem:[%s200_s20 + $0x30] sm:$0xff]  ;;  %s210_s11 = scalar_lea.vmem %s1057_s4, %s818_s8 }
  0x11   : > { %v980_v2 = vld [vmem:[%s200_s20] sm:$0xff]  ;;  %v225_v3 = vadd.f32 %v978_v1, %v976_v0  ;;  %v984_v4 = vld [vmem:[%s200_s20 + $0x8] sm:$0xff]  ;;  %v988_v6 = vld [vmem:[%s200_s20 + $0x38] sm:$0xff]  ;;  %v241_v15 = vmax.f32 %v976_v0, %v978_v1 }
  0x12   : > { %v219_v7 = vadd.f32 %v984_v4, %v980_v2  ;;  %v992_v8 = vld [vmem:[%s200_s20 + $0x10] sm:$0xff]  ;;  %v994_v9 = vld [vmem:[%s200_s20 + $0x18] sm:$0xff]  ;;  %v228_v10 = vadd.f32 %v988_v6, %v986_v5  ;;  %v235_v13 = vmax.f32 %v980_v2, %v984_v4  ;;  %v244_v14 = vmax.f32 %v986_v5, %v988_v6 }
  0x13   : > { %226 = vadd.xlane.f32.xlu1 %v225_v3  ;;  %v222_v11 = vadd.f32 %v994_v9, %v992_v8  ;;  %v238_v12 = vmax.f32 %v992_v8, %v994_v9 }
  0x14   : > { %220 = vadd.xlane.f32.xlu0 %v219_v7 }
  0x17   : > { %229 = vadd.xlane.f32.xlu1 %v228_v10 }
  0x18   : > { %223 = vadd.xlane.f32.xlu0 %v222_v11 }
  0x1b   : > { %239 = vmax.xlane.f32.xlu1 %v238_v12 }
  0x1c   : > { %236 = vmax.xlane.f32.xlu0 %v235_v13 }
  0x1f   : > { %245 = vmax.xlane.f32.xlu1 %v244_v14 }
  0x20   : > { %242 = vmax.xlane.f32.xlu0 %v241_v15 }
  0xa0   : > { %v227_v18 = vpop.xlane.xlu1 %226 }
  0xa1   : > { %v221_v19 = vpop.xlane.xlu0 %220  ;;  %v233_v24 = vmul.f32 0.00390625, %v227_v18 }
  0xa2   : > { %v231_v22 = vmul.f32 0.00390625, %v221_v19 }
  0xa4   : > { %v230_v20 = vpop.xlane.xlu1 %229 }
  0xa5   : > { %v224_v21 = vpop.xlane.xlu0 %223  ;;  %v234_v25 = vmul.f32 0.00390625, %v230_v20 }
  0xa6   : > { %v232_v23 = vmul.f32 0.00390625, %v224_v21 }
  0xa7   : > { %v881_v29 = vpack.c.bf16 %v234_v25, %v233_v24 }
  0xa8   : > { %v878_v26 = vpack.c.bf16 %v232_v23, %v231_v22  ;;  %v240_v27 = vpop.xlane.xlu1 %239 }
  0xa9   : > { %v237_v28 = vpop.xlane.xlu0 %236 }
  0xaa   : > { %879 = vmatpush3.bf16.msra.mxu1 %v878_v26  ;;  %v884_v30 = vpack.c.bf16 %v240_v27, %v237_v28 }
  0xab   : > { %880 = vmatprep.subr.bf16.mxu1 %v931_v16 }
  0xac   : > { %v246_v32 = vpop.xlane.xlu1 %245 }
  0xad   : > { %v243_v33 = vpop.xlane.xlu0 %242 }
  0xae   : > { %882 = vmatpush3.bf16.msra.mxu1 %v881_v29  ;;  %v887_v34 = vpack.c.bf16 %v246_v32, %v243_v33 }
  0xaf   : > { %883 = vmatprep.subr.bf16.mxu1 %v931_v16 }
  0xb1   : > { %848 = vmatmul.mubr.msk.f32.vlgmr.msra.gmra.mrb[0].mxu1 %vm248_vm1, %v247_v31 }
  0xb2   : > { %885 = vmatpush3.bf16.msra.mxu1 %v884_v30  ;;  %858 = vmatprep.mubr.msk.f32.mxu1 %vm932_vm0, %v933_v17 }
  0xb3   : > { %886 = vmatprep.subr.bf16.mxu1 %v931_v16 }
  0xb6   : > { %888 = vmatpush3.bf16.msra.mxu1 %v887_v34 }
  0xb9   : > { %859 = vmatmul.mubr.msk.f32.vlgmr.msra.gmra.mrb[2].mxu1 %vm248_vm1, %v247_v31 }
 0x184   : > { %v318_v36 = vpop.f32.mrb[0].mxu1 }
 0x185   : > { %v849_v37 = vpop.f32.mrb[1].mxu1  ;;  %v322_v42 = vmax.f32 %v318_v36, 0.0 }
 0x18c   : > { %v393_v38 = vpop.f32.mrb[2].mxu1 }
 0x18d   : > { %v397_v39 = vmax.f32 %v393_v38, 0.0  ;;  %v860_v40 = vpop.f32.mrb[3].mxu1 }
 0x18f   : > { %861 = vmatprep.subr.msk.mxu0 %vm411_vm3, %v397_v39 }
 0x190   : > { %862 = vmatpush3.msk.msra.mxu0 %vm411_vm3, %v397_v39 }
 0x191   : > { %864 = vmatmul.mubr.msk.f32.vlgmr.msra.gmra.mrb[0].mxu0 %vm398_vm2, %v324_v41  ;;  %869 = vmatprep.subr.msk.mxu0 %vm411_vm3, %v322_v42 }
 0x192   : > { %870 = vmatpush3.msk.msra.mxu0 %vm411_vm3, %v322_v42  ;;  %866 = vmatprep.mubr.msk.f32.mxu0 %vm398_vm2, %v325_v43 }
 0x195   : > { %867 = vmatmul.mubr.msk.f32.gmra.mrb[2].mxu0 %vm398_vm2, %v326_v44 }
 0x196   : > { %871 = vmatprep.mubr.msk.f32.mxu0 %vm398_vm2, %v323_v35 }
 0x199   : > { %872 = vmatmul.mubr.msk.f32.vlgmr.msra.gmra.mrb[0].mxu0 %vm398_vm2, %v324_v41 }
 0x19a   : > { %874 = vmatprep.mubr.msk.f32.mxu0 %vm398_vm2, %v325_v43 }
 0x19d   : > { %875 = vmatmul.mubr.msk.f32.gmra.mrb[2].mxu0 %vm398_vm2, %v326_v44 }
 0x26c   : > { %v873_v46 = vpop.f32.mrb[0].mxu0 }
 0x26d   : > { %v589_v47 = vsub.f32 0.0, %v873_v46  ;;  %v569_v48 = vpop.f32.mrb[1].mxu0 }
 0x26e   : > { %v588_v49 = vsub.f32 0.0, %v569_v48 }
 0x26f   : > { %v594_v50 = vmul.f32 1.442695, %v589_v47 }
 0x270   : > { %v592_v51 = vmul.f32 1.442695, %v588_v49  ;;  %v876_v52 = vpop.f32.mrb[2].mxu0 }
 0x271   : > { %907 = vpow2.f32 %v594_v50  ;;  %v591_v53 = vsub.f32 0.0, %v876_v52  ;;  %v579_v54 = vpop.f32.mrb[3].mxu0 }
 0x272   : > { %909 = vpow2.f32 %v592_v51  ;;  %v590_v55 = vsub.f32 0.0, %v579_v54 }
 0x273   : > { %v598_v56 = vmul.f32 1.442695, %v591_v53 }
 0x274   : > { %v596_v57 = vmul.f32 1.442695, %v590_v55 }
 0x275   : > { %911 = vpow2.f32 %v598_v56 }
 0x276   : > { %913 = vpow2.f32 %v596_v57 }
 0x27b   : > { %v908_v58 = vpop.eup %907 }
 0x27c   : > { %v910_v59 = vpop.eup %909  ;;  %v601_v60 = vadd.f32 1.0, %v908_v58 }
 0x27d   : > { %v600_v61 = vadd.f32 1.0, %v910_v59 }
 0x27e   : > { %915 = vrcp.f32 %v601_v60 }
 0x27f   : > { %v912_v62 = vpop.eup %911  ;;  %917 = vrcp.f32 %v600_v61 }
 0x280   : > { %v914_v63 = vpop.eup %913  ;;  %v603_v7 = vadd.f32 1.0, %v912_v62 }
 0x281   : > { %v602_v3 = vadd.f32 1.0, %v914_v63 }
 0x283   : > { %919 = vrcp.f32 %v602_v3 }
 0x284   : > { %921 = vrcp.f32 %v603_v7 }
 0x288   : > { %v916_v10 = vpop.eup %915 }
 0x289   : > { %v918_v11 = vpop.eup %917  ;;  %619 = vperm.xlu1 %906, %v916_v10  }
 0x28a   : > { %614 = vperm.xlu0 %905, %v918_v11  }
 0x28d   : > { %v920_v12 = vpop.eup %919 }
 0x28e   : > { %624 = vperm.xlu1 %906, %v920_v12   ;;  %v922_v13 = vpop.eup %921 }
 0x292   : > { %629 = vperm.xlu1 %906, %v922_v13  }
 0x308   : > { %v620_v14 = vpop.permute.xlu1 %619 }
 0x309   : > { %v634_v15 = vmul.f32 %v620_v14, %v992_v8  ;;  %v635_v16 = vmul.f32 %v620_v14, %v994_v9  ;;  %v615_v17 = vpop.permute.xlu0 %614 }
 0x30a   : > { %v632_v18 = vmul.f32 %v615_v17, %v980_v2  ;;  %v633_v19 = vmul.f32 %v615_v17, %v984_v4 }
 0x30b   : > { %642 = vst [vmem:[%s205_s7 + $0x10] sm:$0xff] %v634_v15  ;;  %643 = vst [vmem:[%s205_s7 + $0x18] sm:$0xff] %v635_v16 }
 0x30c   : > { %640 = vst [vmem:[%s205_s7] sm:$0xff] %v632_v18  ;;  %641 = vst [vmem:[%s205_s7 + $0x8] sm:$0xff] %v633_v19  ;;  %v648_v23 = vadd.f32 %v634_v15, %v632_v18  ;;  %v657_v24 = vadd.f32 %v635_v16, %v633_v19 }
 0x30d   : > { %v625_v20 = vpop.permute.xlu1 %624 }
 0x30e   : > { %v636_v21 = vmul.f32 %v625_v20, %v976_v0  ;;  %v637_v22 = vmul.f32 %v625_v20, %v978_v1 }
 0x310   : > { %644 = vst [vmem:[%s205_s7 + $0x20] sm:$0xff] %v636_v21  ;;  %645 = vst [vmem:[%s205_s7 + $0x28] sm:$0xff] %v637_v22  ;;  %v649_v9 = vadd.f32 %v648_v23, %v636_v21  ;;  %v658_v25 = vadd.f32 %v657_v24, %v637_v22  ;;  %v669_v26 = vmax.f32 %v632_v18, %v636_v21 }
 0x311   : > { %v630_v8 = vpop.permute.xlu1 %629  ;;  %v678_v27 = vmax.f32 %v633_v19, %v637_v22 }
 0x312   : > { %v638_v2 = vmul.f32 %v630_v8, %v986_v5  ;;  %v639_v4 = vmul.f32 %v630_v8, %v988_v6 }
 0x314   : > { %646 = vst [vmem:[%s205_s7 + $0x30] sm:$0xff] %v638_v2  ;;  %647 = vst [vmem:[%s205_s7 + $0x38] sm:$0xff] %v639_v4  ;;  %v650_v28 = vadd.f32 %v649_v9, %v638_v2  ;;  %v659_v29 = vadd.f32 %v658_v25, %v639_v4  ;;  %v670_v0 = vmax.f32 %v634_v15, %v638_v2 }
 0x315   : > { %v679_v30 = vmax.f32 %v635_v16, %v639_v4 }
 0x316   : > { %v651_v1 = vrot.slane %v650_v28, 4  ;;  %v660_v31 = vrot.slane %v659_v29, 4  ;;  %v671_v32 = vmax.f32 %v669_v26, %v670_v0 }
 0x317   : > { %v680_v33 = vmax.f32 %v678_v27, %v679_v30 }
 0x318   : > { %v652_v34 = vadd.f32 %v651_v1, %v650_v28  ;;  %v661_v35 = vadd.f32 %v660_v31, %v659_v29  ;;  %v672_v36 = vrot.slane %v671_v32, 4 }
 0x319   : > { %v681_v37 = vrot.slane %v680_v33, 4 }
 0x31a   : > { %v653_v38 = vrot.slane %v652_v34, 2  ;;  %v662_v5 = vrot.slane %v661_v35, 2  ;;  %v673_v6 = vmax.f32 %v671_v32, %v672_v36 }
 0x31b   : > { %v682_v39 = vmax.f32 %v680_v33, %v681_v37 }
 0x31c   : > { %v654_v40 = vadd.f32 %v653_v38, %v652_v34  ;;  %v663_v41 = vadd.f32 %v662_v5, %v661_v35  ;;  %v674_v42 = vrot.slane %v673_v6, 2 }
 0x31d   : > { %v683_v43 = vrot.slane %v682_v39, 2 }
 0x31e   : > { %v655_v44 = vrot.slane %v654_v40, 1  ;;  %v664_v45 = vrot.slane %v663_v41, 1  ;;  %v675_v46 = vmax.f32 %v673_v6, %v674_v42 }
 0x31f   : > { %v684_v47 = vmax.f32 %v682_v39, %v683_v43 }
 0x320   : > { %v656_v48 = vadd.f32 %v655_v44, %v654_v40  ;;  %v665_v49 = vadd.f32 %v664_v45, %v663_v41  ;;  %v676_v50 = vrot.slane %v675_v46, 1 }
 0x321   : > { %v685_v51 = vrot.slane %v684_v47, 1 }
 0x322   : > { %v667_v52 = vmul.f32 0.03125, %v656_v48  ;;  %v668_v53 = vmul.f32 0.03125, %v665_v49  ;;  %v677_v54 = vmax.f32 %v675_v46, %v676_v50 }
 0x323   : > { %v686_v55 = vmax.f32 %v684_v47, %v685_v51 }
 0x324   : > { %v688_v56 = vsel %vm687_vm4, %v667_v52, %v677_v54 }
 0x325   : > { %v689_v57 = vsel %vm687_vm4, %v668_v53, %v686_v55 }
 0x326   : > { %v692_v58 = vcombine.low %v688_v56, %v689_v57 }
 0x328   : > { %813 = vst.sshfl [vmem:[%s210_s11] sm:$0x33 pattern:$0x76325410] %v692_v58 }
 0x329 PF: > { %s15_s15 = sadd.s32 1, %s929_s15  }
 0x32a   : > { %p12_p4 = scmp.ge.s32.totalorder %s15_s15, 4  }
 0x32c   :  { %14 = sbr.rel (!%p12_p4) target bundleno = 1 (0x1), region = 74 }

// kernel: cbam_forward.3
= control target key start
LH: loop header
LB: loop body
LE: loop exit
PB: predicated region body
PF: predicated region fallthrough
CT: control target
= control target key end

     0   :  { %s499_s12 = smov 0   ;;  %s554_s0 = inlined_call_operand.vmem [shape: f32[2,32,256], index: 0, kind: input, shape index: {}]   ;;  %s555_s1 = inlined_call_operand.vmem [shape: f32[2,98,256], index: 1, kind: input, shape index: {}]   ;;  %s556_s2 = inlined_call_operand.vmem [shape: f32[1,98], index: 2, kind: input, shape index: {}]   ;;  %s557_s3 = inlined_call_operand.vmem [shape: f32[2,32,256], index: 3, kind: output, shape index: {}]  }
   0x1 LB: > { %s411_s13 = sadd.s32 4294967295, %s476_s12   ;;  %p415_p0 = scmp.ge.s32.totalorder %s476_s12, 1  ;;  %s476_s12 = sphi %s499_s12, %s13_s12  }
   0x2   : > { %p147_p1 = scmp.lt.s32.totalorder %s476_s12, 3 }
   0x4   : > { %p148_p2 = pnand %p415_p0, %p147_p1 }
   0x5   : > { %p176_p3 = scmp.lt.s32.totalorder (!%p148_p2), %s411_s13, 1  ;;  %v478_v0 = vmov (!%p148_p2), 0.0   ;;  %vm222_vm0 = vcmask (!%p148_p2), 1041408   ;;  %v191_v39 = vld [vmem:[%s556_s2] sm:$0x1] (!%p148_p2)  ;;  %vm218_vm1 = vcmask (!%p148_p2), 801792   ;;  %v320_v49 = vlaneseq (!%p148_p2) }
   0x6   : > { %151 = sbr.rel (%p148_p2) target bundleno = 294 (0x126), region = 32  ;;  %293 = vmatprep.mubr.f32.mxu0 (!%p148_p2), %v478_v0 }
   0x7   : > { %v321_v51 = vshrl.u32 (!%p148_p2), %v320_v49, 7 }
   0x9   : > { %v322_v52 = vsub.s32 (!%p148_p2), 0, %v321_v51 }
   0xd   : > { %s559_s13 = smov (!%p176_p3, %s411_s13), 1 }
   0xe   : > { %s452_s14 = smul.u32 208, %s559_s13  ;;  %s426_s20 = sshll.u32 %s559_s13, 6 }
   0xf   : > { %s180_s23 = scalar_lea.vmem %s554_s0, %s426_s20  ;;  %s190_s26 = scalar_lea.vmem %s557_s3, %s426_s20 }
  0x10   : > { %s513_s17 = scalar_lea.vmem %s555_s1, %s452_s14  ;;  %v312_v53 = vld [vmem:[%s180_s23] sm:$0xff]  ;;  %v314_v54 = vld [vmem:[%s180_s23 + $0x10] sm:$0xff]  ;;  %v313_v58 = vld [vmem:[%s180_s23 + $0x8] sm:$0xff] }
  0x11   : > { %v193_v1 = vld [vmem:[%s513_s17 + $0x8] sm:$0xff]  ;;  %v195_v2 = vld [vmem:[%s513_s17 + $0x18] sm:$0xff]  ;;  %v192_v3 = vld [vmem:[%s513_s17] sm:$0xff] }
  0x12   : > { %v428_v4 = vpack.c.bf16 %v195_v2, %v193_v1  ;;  %v194_v5 = vld [vmem:[%s513_s17 + $0x10] sm:$0xff]  ;;  %v197_v6 = vld [vmem:[%s513_s17 + $0x28] sm:$0xff]  ;;  %v199_v7 = vld [vmem:[%s513_s17 + $0x38] sm:$0xff] }
  0x13   : > { %v430_v8 = vpack.c.bf16 %v194_v5, %v192_v3  ;;  %v432_v9 = vpack.c.bf16 %v199_v7, %v197_v6  ;;  %v196_v10 = vld [vmem:[%s513_s17 + $0x20] sm:$0xff]  ;;  %v198_v11 = vld [vmem:[%s513_s17 + $0x30] sm:$0xff]  ;;  %v201_v12 = vld [vmem:[%s513_s17 + $0x48] sm:$0xff] }
  0x14   : > { %429 = vmatprep.subr.bf16.mxu0 %v428_v4  ;;  %v203_v13 = vld [vmem:[%s513_s17 + $0x58] sm:$0xff]  ;;  %v434_v14 = vpack.c.bf16 %v198_v11, %v196_v10  ;;  %v200_v16 = vld [vmem:[%s513_s17 + $0x40] sm:$0xff]  ;;  %v202_v17 = vld [vmem:[%s513_s17 + $0x50] sm:$0xff] }
  0x15   : > { %431 = vmatpush1.bf16.msra.mxu0 %v430_v8  ;;  %v436_v15 = vpack.c.bf16 %v203_v13, %v201_v12  ;;  %v205_v18 = vld [vmem:[%s513_s17 + $0x68] sm:$0xff]  ;;  %v207_v19 = vld [vmem:[%s513_s17 + $0x78] sm:$0xff]  ;;  %v438_v20 = vpack.c.bf16 %v202_v17, %v200_v16  ;;  %v204_v22 = vld [vmem:[%s513_s17 + $0x60] sm:$0xff] }
  0x16   : > { %433 = vmatprep.subr.bf16.mxu0 %v432_v9  ;;  %v440_v21 = vpack.c.bf16 %v207_v19, %v205_v18  ;;  %v206_v23 = vld [vmem:[%s513_s17 + $0x70] sm:$0xff]  ;;  %v209_v24 = vld [vmem:[%s513_s17 + $0x88] sm:$0xff]  ;;  %v211_v25 = vld [vmem:[%s513_s17 + $0x98] sm:$0xff] }
  0x17   : > { %v442_v26 = vpack.c.bf16 %v206_v23, %v204_v22  ;;  %v444_v27 = vpack.c.bf16 %v211_v25, %v209_v24  ;;  %v208_v28 = vld [vmem:[%s513_s17 + $0x80] sm:$0xff]  ;;  %v210_v29 = vld [vmem:[%s513_s17 + $0x90] sm:$0xff]  ;;  %v213_v30 = vld [vmem:[%s513_s17 + $0xa8] sm:$0xff] }
  0x18   : > { %v215_v31 = vld [vmem:[%s513_s17 + $0xb8] sm:$0xff]  ;;  %v446_v32 = vpack.c.bf16 %v210_v29, %v208_v28  ;;  %v212_v34 = vld [vmem:[%s513_s17 + $0xa0] sm:$0xff]  ;;  %v214_v35 = vld [vmem:[%s513_s17 + $0xb0] sm:$0xff] }
  0x19   : > { %435 = vmatpush1.bf16.msra.mxu0 %v434_v14  ;;  %v448_v33 = vpack.c.bf16 %v215_v31, %v213_v30  ;;  %v450_v36 = vpack.c.bf16 %v214_v35, %v212_v34  ;;  %v217_v37 = vld [vmem:[%s513_s17 + $0xc8] sm:$0x3]  ;;  %v216_v38 = vld [vmem:[%s513_s17 + $0xc0] sm:$0x3]  ;;  %v318_v57 = vld [vmem:[%s180_s23 + $0x30] sm:$0xff] }
  0x1a   : > { %437 = vmatprep.subr.bf16.mxu0 %v436_v15  ;;  %v316_v56 = vld [vmem:[%s180_s23 + $0x20] sm:$0xff]  ;;  %v315_v61 = vld [vmem:[%s180_s23 + $0x18] sm:$0xff]  ;;  %v317_v62 = vld [vmem:[%s180_s23 + $0x28] sm:$0xff] }
  0x1b   : > { %v319_v63 = vld [vmem:[%s180_s23 + $0x38] sm:$0xff] }
  0x1d   : > { %439 = vmatpush1.bf16.msra.mxu0 %v438_v20 }
  0x1e   : > { %441 = vmatprep.subr.bf16.mxu0 %v440_v21 }
  0x21   : > { %443 = vmatpush1.bf16.msra.mxu0 %v442_v26 }
  0x22   : > { %445 = vmatprep.subr.bf16.mxu0 %v444_v27 }
  0x25   : > { %447 = vmatpush1.bf16.msra.mxu0 %v446_v32 }
  0x26   : > { %449 = vmatprep.subr.bf16.mxu0 %v448_v33 }
  0x29   : > { %451 = vmatpush1.bf16.msra.mxu0 %v450_v36 }
  0x2a   : > { %421 = vmatprep.subr.msk.mxu0 %vm222_vm0, %v217_v37 }
  0x2d   : > { %422 = vmatpush1.msk.msra.mxu0 %vm222_vm0, %v216_v38 }
  0x2e   : > { %423 = vmatmul.mubr.msk.f32.vlgmr.msra.gmra.mrb[0].mxu0 %vm218_vm1, %v191_v39 }
 0x101   : > { %v295_v40 = vpop.f32.mrb[0].mxu0 }
 0x102   : > { %v300_v41 = vsub.f32 0.0, %v295_v40  ;;  %v297_v42 = vpop.f32.mrb[1].mxu0 }
 0x103   : > { %v301_v43 = vsub.f32 0.0, %v297_v42 }
 0x104   : > { %v302_v44 = vmul.f32 1.442695, %v300_v41 }
 0x105   : > { %v304_v45 = vmul.f32 1.442695, %v301_v43 }
 0x106   : > { %462 = vpow2.f32 %v302_v44 }
 0x107   : > { %464 = vpow2.f32 %v304_v45 }
 0x110   : > { %v463_v46 = vpop.eup %462 }
 0x111   : > { %v465_v47 = vpop.eup %464  ;;  %v306_v48 = vadd.f32 1.0, %v463_v46 }
 0x112   : > { %v307_v50 = vadd.f32 1.0, %v465_v47 }
 0x113   : > { %466 = vrcp.f32 %v306_v48 }
 0x114   : > { %468 = vrcp.f32 %v307_v50 }
 0x11d   : > { %v467_v55 = vpop.eup %466 }
 0x11e   : > { %v469_v59 = vpop.eup %468  ;;  %v323_v60 = vrot.slane %v467_v55, %v322_v52 }
 0x11f   : > { %v327_v0 = vrot.slane %v469_v59, %v322_v52 }
 0x120   : > { %v328_v1 = vmul.f32 %v323_v60, %v312_v53  ;;  %v330_v2 = vmul.f32 %v323_v60, %v314_v54  ;;  %v332_v3 = vmul.f32 %v323_v60, %v316_v56  ;;  %v334_v4 = vmul.f32 %v323_v60, %v318_v57 }
 0x121   : > { %v329_v5 = vmul.f32 %v327_v0, %v313_v58  ;;  %v331_v6 = vmul.f32 %v327_v0, %v315_v61  ;;  %v333_v7 = vmul.f32 %v327_v0, %v317_v62  ;;  %v335_v8 = vmul.f32 %v327_v0, %v319_v63 }
 0x122   : > { %336 = vst [vmem:[%s190_s26] sm:$0xff] %v328_v1  ;;  %338 = vst [vmem:[%s190_s26 + $0x10] sm:$0xff] %v330_v2 }
 0x123   : > { %340 = vst [vmem:[%s190_s26 + $0x20] sm:$0xff] %v332_v3  ;;  %342 = vst [vmem:[%s190_s26 + $0x30] sm:$0xff] %v334_v4 }
 0x124   : > { %337 = vst [vmem:[%s190_s26 + $0x8] sm:$0xff] %v329_v5  ;;  %339 = vst [vmem:[%s190_s26 + $0x18] sm:$0xff] %v331_v6 }
 0x125   : > { %341 = vst [vmem:[%s190_s26 + $0x28] sm:$0xff] %v333_v7  ;;  %343 = vst [vmem:[%s190_s26 + $0x38] sm:$0xff] %v335_v8 }
 0x126 PF: > { %s13_s12 = sadd.s32 1, %s476_s12  }
 0x127   : > { %p10_p4 = scmp.ge.s32.totalorder %s13_s12, 4  }
 0x129   :  { %12 = sbr.rel (!%p10_p4) target bundleno = 1 (0x1), region = 65 }

</bundles_post_ra>
